<compile_context>
chip_gen: v5e
topology: v5e:2x2
jax: 0.10.0
libtpu: 0.0.40
codegen_flags: <defaults>
</compile_context>

<pallas_src>
import math

import jax
import jax.numpy as jnp
from jax import lax
from jax.experimental import pallas as pl
from jax.experimental.pallas import tpu as pltpu


# ---------------------------------------------------------------------------
# Kernels (q_ref/k_ref/b_ref/o_ref are 2-D tiles; leading dims squeezed away)
# ---------------------------------------------------------------------------
def _qk_bias_kernel(q_ref, k_ref, b_ref, o_ref):
    # q_ref: (tL, hd) projected+scaled query tile for this (batch, head)
    # k_ref: (tS, hd) projected key tile
    # b_ref: (tL, tS) additive attention bias tile
    # o_ref: (tL, tS) output logits tile
    s = lax.dot_general(q_ref[...], k_ref[...], (((1,), (1,)), ((), ())),
                        preferred_element_type=jnp.float32)
    o_ref[...] = (s + b_ref[...].astype(jnp.float32)).astype(o_ref.dtype)


def _qk_kernel(q_ref, k_ref, o_ref):
    s = lax.dot_general(q_ref[...], k_ref[...], (((1,), (1,)), ((), ())),
                        preferred_element_type=jnp.float32)
    o_ref[...] = s.astype(o_ref.dtype)


# ---------------------------------------------------------------------------
# Helpers
# ---------------------------------------------------------------------------
def _vmem_capacity_bytes():
    """Physical VMEM per TensorCore; conservative fallback = 64 MiB (v7x)."""
    try:
        info = pltpu.get_tpu_info()
        cap = int(getattr(info, "vmem_capacity_bytes", 0) or 0)
        if cap > 0:
            return cap
    except Exception:
        pass
    return 64 * 1024 * 1024


def _pick_tile(dim, preferred, align):
    """Largest TPU-friendly tile <= preferred.

    Returns the full dim if it already fits; otherwise the largest multiple of
    `align` (<= preferred) that divides `dim`; otherwise the aligned preferred
    size (Pallas masks the ragged last block)."""
    if dim <= preferred:
        return dim
    t = (preferred // align) * align
    while t >= align:
        if dim % t == 0:
            return t
        t -= align
    return (preferred // align) * align


# ---------------------------------------------------------------------------
# Wrapper
# ---------------------------------------------------------------------------
def multihead_attention_bias(query, key, in_proj_weight, in_proj_bias,
                             num_heads, attn_bias=None, scale_factor=1,
                             block_l=None, block_s=None,
                             out_dtype=jnp.float32):
    """query: (L, N, E), key: (S, N, E) -> attn logits (N*num_heads, L, S)."""
    L, N, E = query.shape
    S = key.shape[0]
    H = num_heads
    hd = E // H
    assert hd * H == E, "embed_dim must be divisible by num_heads"
    scaling = float(hd * scale_factor) ** (-0.5)

    dt = query.dtype  # compute dtype of the QK^T matmul (bf16 stays bf16)
    in_itemsize = jnp.dtype(dt).itemsize
    out_itemsize = jnp.dtype(out_dtype).itemsize

    # ---- Projections with the (N,H,L,hd) relayout fused into the matmul ----
    wq = in_proj_weight[:E].reshape(H, hd, E)
    wk = in_proj_weight[E:2 * E].reshape(H, hd, E)
    qp = jnp.einsum('lne,hfe->nhlf', query, wq,
                    preferred_element_type=jnp.float32)
    kp = jnp.einsum('sne,hfe->nhsf', key, wk,
                    preferred_element_type=jnp.float32)
    if in_proj_bias is not None:
        bq = in_proj_bias[:E].astype(jnp.float32).reshape(H, hd)
        bk = in_proj_bias[E:2 * E].astype(jnp.float32).reshape(H, hd)
        qp = qp + bq[None, :, None, :]
        kp = kp + bk[None, :, None, :]
    qp = (qp * scaling).astype(dt)   # (N, H, L, hd)
    kp = kp.astype(dt)               # (N, H, S, hd)

    # ---- Bias handling: accept broadcast shapes without materializing ------
    has_bias = attn_bias is not None
    bias_kind = None
    ab = None
    if has_bias:
        ab = attn_bias
        if ab.ndim == 4 and ab.shape[0] == 1 and ab.shape[1:] == (H, L, S):
            ab = ab[0]
        if ab.ndim == 4 and ab.shape == (N, H, L, S):
            bias_kind = "nhls"
        elif ab.ndim == 3 and ab.shape == (N * H, L, S):
            if N == 1:
                bias_kind = "hls"                 # identical, cheaper spec
            else:
                ab = ab.reshape(N, H, L, S)
                bias_kind = "nhls"
        elif ab.ndim == 3 and ab.shape == (H, L, S):
            bias_kind = "hls"                     # broadcast over batch
        elif ab.ndim == 2 and ab.shape == (L, S):
            bias_kind = "ls"                      # broadcast over batch & head
        else:
            raise ValueError(
                f"attn_bias shape {attn_bias.shape} not broadcastable to "
                f"({N * H}, {L}, {S})")
        bias_itemsize = jnp.dtype(ab.dtype).itemsize
    else:
        bias_itemsize = 0

    # ---- Tiling: big, lane-dense tiles sized to a generation-aware budget --
    cap = _vmem_capacity_bytes()
    budget = min(cap // 2 - 4 * 1024 * 1024, 48 * 1024 * 1024)  # ~28MiB on v7x

    def _footprint_bytes(tl, ts):
        f = 2 * tl * hd * in_itemsize        # Q block, double-buffered
        f += 2 * ts * hd * in_itemsize       # K block
        f += 2 * tl * ts * out_itemsize      # output block
        f += tl * ts * 4                     # Mosaic internal f32 dot scratch
        if has_bias:
            f += 2 * tl * ts * bias_itemsize
        return f

    auto = block_l is None and block_s is None
    if has_bias:
        ts_pref = 2048 if S >= 4096 else 1024
    else:
        ts_pref = 2048                        # no-bias path moves half the bytes
    tL = block_l if block_l is not None else _pick_tile(L, 512, 8)
    tS = block_s if block_s is not None else _pick_tile(S, ts_pref, 128)

    if auto:
        while _footprint_bytes(tL, tS) > budget:
            if tS > 256:
                tS = max(256, (tS // 2) // 128 * 128)
            elif tL > 64:
                tL = max(64, (tL // 2) // 8 * 8)
            elif tS > 128:
                tS = 128
            elif tL > 8:
                tL = max(8, (tL // 2) // 8 * 8)
            else:
                break

    nL = pl.cdiv(L, tL)
    nS = pl.cdiv(S, tS)
    grid = (N, H, nL, nS)

    q_spec = pl.BlockSpec((None, None, tL, hd), lambda b, h, i, j: (b, h, i, 0))
    k_spec = pl.BlockSpec((None, None, tS, hd), lambda b, h, i, j: (b, h, j, 0))
    o_spec = pl.BlockSpec((None, None, tL, tS), lambda b, h, i, j: (b, h, i, j))

    # ---- VMEM limit: always set, never above physical capacity -------------
    est = _footprint_bytes(tL, tS)
    vmem_limit = int(min(max(2 * est, 32 * 1024 * 1024),
                         cap - 8 * 1024 * 1024))
    compiler_params = pltpu.CompilerParams(
        dimension_semantics=("parallel", "parallel", "parallel", "arbitrary"),
        vmem_limit_bytes=vmem_limit,
    )

    # ---- Cost estimate (helps XLA schedule the surrounding projections) ----
    bias_bytes = (ab.size * bias_itemsize) if has_bias else 0
    cost = pl.CostEstimate(
        flops=2 * N * H * L * S * hd,
        transcendentals=0,
        bytes_accessed=(N * H * L * S * out_itemsize
                        + N * H * L * hd * in_itemsize
                        + N * H * S * hd * in_itemsize
                        + bias_bytes),
    )

    out_shape = jax.ShapeDtypeStruct((N, H, L, S), out_dtype)

    if has_bias:
        if bias_kind == "nhls":
            b_spec = pl.BlockSpec((None, None, tL, tS),
                                  lambda b, h, i, j: (b, h, i, j))
        elif bias_kind == "hls":
            b_spec = pl.BlockSpec((None, tL, tS),
                                  lambda b, h, i, j: (h, i, j))
        else:  # "ls"
            b_spec = pl.BlockSpec((tL, tS), lambda b, h, i, j: (i, j))
        out = pl.pallas_call(
            _qk_bias_kernel,
            out_shape=out_shape,
            grid=grid,
            in_specs=[q_spec, k_spec, b_spec],
            out_specs=o_spec,
            compiler_params=compiler_params,
            cost_estimate=cost,
        )(qp, kp, ab)
    else:
        out = pl.pallas_call(
            _qk_kernel,
            out_shape=out_shape,
            grid=grid,
            in_specs=[q_spec, k_spec],
            out_specs=o_spec,
            compiler_params=compiler_params,
            cost_estimate=cost,
        )(qp, kp)

    return out.reshape(N * H, L, S)


# ---------------------------------------------------------------------------
# Pure-JAX reference (transcription of multi_head_attention_bias defaults)
# ---------------------------------------------------------------------------
def _reference(query, key, W, b, num_heads, scale_factor, attn_bias):
    L, N, E = query.shape
    S = key.shape[0]
    H = num_heads
    hd = E // H
    scaling = float(hd * scale_factor) ** (-0.5)
    q = query.astype(jnp.float32) @ W[:E].T.astype(jnp.float32) + b[:E]
    k = key.astype(jnp.float32) @ W[E:2 * E].T.astype(jnp.float32) + b[E:2 * E]
    q = q * scaling
    q = q.reshape(L, N * H, hd).transpose(1, 0, 2)   # (N*H, L, hd)
    k = k.reshape(S, N * H, hd).transpose(1, 0, 2)   # (N*H, S, hd)
    w = jnp.einsum('bld,bsd->bls', q, k)
    if attn_bias is not None:
        w = w + attn_bias.astype(jnp.float32)
    return w


if __name__ == "__main__":
    # --- Test A: tiny shapes consistent with the module, full attn_bias ----
    L, S, N, E, H = 8, 8, 2, 32, 4
    key0 = jax.random.PRNGKey(0)
    k_q, k_k, k_w, k_ab = jax.random.split(key0, 4)

    query = jax.random.normal(k_q, (L, N, E), dtype=jnp.float32)
    keyt = jax.random.normal(k_k, (S, N, E), dtype=jnp.float32)

    # in_proj_weight: (2E, E) xavier_uniform; in_proj_bias: zeros (as in init)
    bound = math.sqrt(6.0 / (E + 2 * E))
    W = jax.random.uniform(k_w, (2 * E, E), dtype=jnp.float32,
                           minval=-bound, maxval=bound)
    b = jnp.zeros((2 * E,), jnp.float32)
    attn_bias = 0.1 * jax.random.normal(k_ab, (N * H, L, S), dtype=jnp.float32)

    out = jax.block_until_ready(
        multihead_attention_bias(query, keyt, W, b, H, attn_bias=attn_bias))
    ref = _reference(query, keyt, W, b, H, 1, attn_bias)
    assert out.shape == (N * H, L, S)
    assert jnp.allclose(out, ref, atol=1e-4, rtol=1e-4), \
        f"A: max abs diff {jnp.max(jnp.abs(out - ref))}"

    # --- Test B: same shapes, no attn_bias (no zero tensor materialized) ---
    out2 = jax.block_until_ready(
        multihead_attention_bias(query, keyt, W, b, H, attn_bias=None))
    ref2 = _reference(query, keyt, W, b, H, 1, None)
    assert jnp.allclose(out2, ref2, atol=1e-4, rtol=1e-4), \
        f"B: max abs diff {jnp.max(jnp.abs(out2 - ref2))}"

    # --- Test C: medium shapes, broadcast (H, L, S) bias, explicit tiles ---
    L2, S2, N2, E2, H2 = 128, 256, 2, 64, 4
    kq2, kk2, kw2, kb2, ka2 = jax.random.split(jax.random.PRNGKey(1), 5)
    query2 = jax.random.normal(kq2, (L2, N2, E2), dtype=jnp.float32)
    keyt2 = jax.random.normal(kk2, (S2, N2, E2), dtype=jnp.float32)
    bound2 = math.sqrt(6.0 / (E2 + 2 * E2))
    W2 = jax.random.uniform(kw2, (2 * E2, E2), dtype=jnp.float32,
                            minval=-bound2, maxval=bound2)
    b2 = 0.01 * jax.random.normal(kb2, (2 * E2,), dtype=jnp.float32)
    ab2 = 0.1 * jax.random.normal(ka2, (H2, L2, S2), dtype=jnp.float32)

    out3 = jax.block_until_ready(
        multihead_attention_bias(query2, keyt2, W2, b2, H2, attn_bias=ab2,
                                 block_l=64, block_s=128))
    ab2_full = jnp.broadcast_to(ab2[None], (N2, H2, L2, S2)
                                ).reshape(N2 * H2, L2, S2)
    ref3 = _reference(query2, keyt2, W2, b2, H2, 1, ab2_full)
    assert out3.shape == (N2 * H2, L2, S2)
    assert jnp.allclose(out3, ref3, atol=2e-3, rtol=2e-3), \
        f"C: max abs diff {jnp.max(jnp.abs(out3 - ref3))}"

    # --- Test D: bf16 logits output (opt-in reduced precision path) --------
    out4 = jax.block_until_ready(
        multihead_attention_bias(query, keyt, W, b, H, attn_bias=attn_bias,
                                 out_dtype=jnp.bfloat16))
    assert out4.dtype == jnp.bfloat16
    assert jnp.allclose(out4.astype(jnp.float32), ref, atol=5e-2, rtol=5e-2), \
        f"D: max abs diff {jnp.max(jnp.abs(out4.astype(jnp.float32) - ref))}"

    print("KERNEL_OK")
</pallas_src>

<mosaic_0001>
module attributes {stable_mosaic.version = 11 : i64} {
  func.func @_qk_bias_kernel(%arg0: i32, %arg1: i32, %arg2: i32, %arg3: i32, %arg4: memref<1x1x8x8xf32, #tpu.memory_space<vmem>>, %arg5: memref<1x1x8x8xf32, #tpu.memory_space<vmem>>, %arg6: memref<1x1x8x8xf32, #tpu.memory_space<vmem>>, %arg7: memref<1x1x8x8xf32, #tpu.memory_space<vmem>>) attributes {dimension_semantics = [#tpu.dimension_semantics<parallel>, #tpu.dimension_semantics<parallel>, #tpu.dimension_semantics<parallel>, #tpu.dimension_semantics<arbitrary>], iteration_bounds = array<i64: 2, 4, 1, 1>, scalar_prefetch = 0 : i64, scratch_operands = 0 : i64, tpu.core_type = #tpu.core_type<tc>, window_params = [{transform_indices = @transform_0, window_bounds = array<i64: 1, 1, 8, 8>}, {transform_indices = @transform_1, window_bounds = array<i64: 1, 1, 8, 8>}, {transform_indices = @transform_2, window_bounds = array<i64: 1, 1, 8, 8>}, {transform_indices = @transform_3, window_bounds = array<i64: 1, 1, 8, 8>}]} {
    %c0 = arith.constant 0 : index
    %c0_0 = arith.constant 0 : index
    %c0_1 = arith.constant 0 : index
    %c0_2 = arith.constant 0 : index
    %0 = vector.load %arg4[%c0, %c0_0, %c0_1, %c0_2] : memref<1x1x8x8xf32, #tpu.memory_space<vmem>>, vector<1x1x8x8xf32>
    %1 = vector.shape_cast %0 : vector<1x1x8x8xf32> to vector<8x8xf32>
    %c0_3 = arith.constant 0 : index
    %c0_4 = arith.constant 0 : index
    %c0_5 = arith.constant 0 : index
    %c0_6 = arith.constant 0 : index
    %2 = vector.load %arg5[%c0_3, %c0_4, %c0_5, %c0_6] : memref<1x1x8x8xf32, #tpu.memory_space<vmem>>, vector<1x1x8x8xf32>
    %3 = vector.shape_cast %2 : vector<1x1x8x8xf32> to vector<8x8xf32>
    %cst = arith.constant dense<0.000000e+00> : vector<8x8xf32>
    %4 = tpu.matmul %1, %3, %cst {dimension_numbers = #tpu.dot_dimension_numbers<[1], [1], [0], [0], [0, 0, 1, 0], [], []>} : vector<8x8xf32>, vector<8x8xf32>, vector<8x8xf32> -> vector<8x8xf32>
    %c0_7 = arith.constant 0 : index
    %c0_8 = arith.constant 0 : index
    %c0_9 = arith.constant 0 : index
    %c0_10 = arith.constant 0 : index
    %5 = vector.load %arg6[%c0_7, %c0_8, %c0_9, %c0_10] : memref<1x1x8x8xf32, #tpu.memory_space<vmem>>, vector<1x1x8x8xf32>
    %6 = vector.shape_cast %5 : vector<1x1x8x8xf32> to vector<8x8xf32>
    %7 = arith.addf %4, %6 : vector<8x8xf32>
    %c0_11 = arith.constant 0 : index
    %c0_12 = arith.constant 0 : index
    %c0_13 = arith.constant 0 : index
    %c0_14 = arith.constant 0 : index
    %8 = vector.load %arg7[%c0_11, %c0_12, %c0_13, %c0_14] : memref<1x1x8x8xf32, #tpu.memory_space<vmem>>, vector<1x1x8x8xf32>
    %9 = vector.shape_cast %8 : vector<1x1x8x8xf32> to vector<8x8xf32>
    %10 = vector.shape_cast %7 : vector<8x8xf32> to vector<1x1x8x8xf32>
    tpu.vector_store %arg7[%c0_11, %c0_12, %c0_13, %c0_14], %10 {strides = array<i32>} : memref<1x1x8x8xf32, #tpu.memory_space<vmem>>, vector<1x1x8x8xf32>,
    return
  }
  func.func @transform_0(%arg0: i32, %arg1: i32, %arg2: i32, %arg3: i32) -> (i32, i32, i32, i32) {
    %c0_i32 = arith.constant 0 : i32
    %c0_i32_0 = arith.constant 0 : i32
    return %arg0, %arg1, %arg2, %c0_i32 : i32, i32, i32, i32
  }
  func.func @transform_1(%arg0: i32, %arg1: i32, %arg2: i32, %arg3: i32) -> (i32, i32, i32, i32) {
    %c0_i32 = arith.constant 0 : i32
    %c0_i32_0 = arith.constant 0 : i32
    return %arg0, %arg1, %arg3, %c0_i32 : i32, i32, i32, i32
  }
  func.func @transform_2(%arg0: i32, %arg1: i32, %arg2: i32, %arg3: i32) -> (i32, i32, i32, i32) {
    %c0_i32 = arith.constant 0 : i32
    return %arg0, %arg1, %arg2, %arg3 : i32, i32, i32, i32
  }
  func.func @transform_3(%arg0: i32, %arg1: i32, %arg2: i32, %arg3: i32) -> (i32, i32, i32, i32) {
    %c0_i32 = arith.constant 0 : i32
    return %arg0, %arg1, %arg2, %arg3 : i32, i32, i32, i32
  }
}

</mosaic_0001>

<bundles_post_ra>
// kernel: tpu_custom_call.1
= control target key start
LH: loop header
LB: loop body
LE: loop exit
PB: predicated region body
PF: predicated region fallthrough
CT: control target
= control target key end

     0   :  { %s1018_s0 = inlined_call_operand.hbm [shape: f32[2,4,8,8], index: 0, kind: input, shape index: {}]   ;;  %s1019_s1 = inlined_call_operand.hbm [shape: f32[2,4,8,8], index: 1, kind: input, shape index: {}]   ;;  %s1020_s2 = inlined_call_operand.hbm [shape: f32[2,4,8,8], index: 2, kind: input, shape index: {}]   ;;  %s1021_s3 = inlined_call_operand.hbm [shape: f32[2,4,8,8], index: 3, kind: output, shape index: {}]  }
   0x1   :  { %1027 = sst [smem:[#allocation18_spill]] %s1019_s1 }
   0x2   :  { %8 = vsyncpa [#allocation3], 0 }
   0x3   :  { %10 = vsyncpa [#allocation3 + $0x1], 0 }
   0x4   :  { %11 = vsyncpa [#allocation6], 0 }
   0x5   :  { %13 = vsyncpa [#allocation6 + $0x1], 0 }
   0x6   :  { %14 = vsyncpa [#allocation4], 0 }
   0x7   :  { %16 = vsyncpa [#allocation4 + $0x1], 0  ;;  %s841_s12 = smov 0   ;;  %s843_s13 = smov 0  }
   0x8   :  { %s845_s14 = smov 0   ;;  %s847_s15 = smov 0  }
   0x9   :  { %s849_s16 = smov 0   ;;  %s851_s17 = smov 0  }
   0xa   :  { %s853_s18 = smov 0   ;;  %s855_s19 = smov 0  }
   0xb LB: > { %1028 = sst [smem:[#allocation12_spill]] %s799_s14  ;;  %s882_s20 = sadd.s32 4294967295, %s819_s19   ;;  %s819_s19 = sphi %s855_s19, %s22_s19   ;;  %s815_s18 = sphi %s853_s18, %s1046_s18   ;;  %s811_s17 = sphi %s851_s17, %s1050_s17   ;;  %s807_s16 = sphi %s849_s16, %s1044_s16   ;;  %s803_s15 = sphi %s847_s15, %s1043_s15   ;;  %s799_s14 = sphi %s845_s14, %s1049_s14   ;;  %s795_s13 = sphi %s843_s13, %s1048_s13   ;;  %s791_s12 = sphi %s841_s12, %s1047_s12  }
   0xc   : > { %1029 = sst [smem:[#allocation13_spill]] %s811_s17  ;;  %s515_s21 = sadd.s32 4294967294, %s819_s19  }
   0xd   : > { %1030 = sst [smem:[#allocation14_spill]] %s815_s18  ;;  %s44_s22 = sadd.s32 1, %s811_s17 }
   0xe   : > { %s48_s23 = sadd.s32 1, %s815_s18  ;;  %p46_p0 = scmp.ge.s32.totalorder %s44_s22, 4 }
   0xf   : > { %s59_s24 = sadd.s32 1, %s799_s14  ;;  %p66_p1 = scmp.ne.s32.totalorder %s799_s14, %s795_s13 }
  0x10   : > { %p67_p2 = scmp.eq.s32.totalorder %s819_s19, 0  ;;  %s1052_s22 = smov (%p46_p0, %s44_s22), 0 }
  0x11   : > { %1031 = sst [smem:[#allocation15_spill]] %s1052_s22  ;;  %s1054_s23 = smov (!%p46_p0, %s48_s23), %s815_s18 }
  0x12   : > { %s53_s25 = ssub.s32 %s811_s17, %s1052_s22  ;;  %p896_p3 = por %p67_p2, %p66_p1 }
  0x13   : > { %p50_p4 = scmp.ge.s32.totalorder %s1054_s23, 2  ;;  %p72_p5 = scmp.ne.s32.totalorder %s795_s13, %s791_s12 }
  0x14   : > { %p73_p6 = scmp.eq.s32.totalorder %s882_s20, 0  ;;  %p164_p7 = scmp.eq.s32.totalorder %s882_s20, 7 }
  0x15   : > { %s1056_s23 = smov (%p50_p4, %s1054_s23), 0  ;;  %p170_p10 = scmp.eq.s32.totalorder %s515_s21, 7 }
  0x16   : > { %1033 = sst [smem:[#allocation16_spill]] %s1056_s23  ;;  %p906_p8 = por %p73_p6, %p72_p5 }
  0x17   : > { %p910_p9 = por %p164_p7, %p66_p1  ;;  %s52_s29 = ssub.s32 %s815_s18, %s1056_s23 }
  0x18   : > { %s54_s30 = sor.u32 %s53_s25, %s52_s29  ;;  %p916_p12 = por %p170_p10, %p72_p5 }
  0x19   : > { %p57_p11 = scmp.eq.s32.totalorder %s54_s30, 0  ;;  %p561_p13 = scmp.lt.s32.totalorder %s819_s19, 8 }
  0x1a   : > { %s190_s5 = sand.u32 1, %s799_s14   ;;  %s519_s8 = sshll.u32 %s815_s18, 2 }
  0x1b   : > { %s923_s6 = scalar_select %p57_p11, %s799_s14, %s59_s24  }
  0x1c   : > { %s518_s7 = sshll.u32 %s190_s5, 3  ;;  %s199_s9 = sadd.s32 %s811_s17, %s519_s8 }
  0x1d   : > { %1037 = sst [smem:[#allocation17_spill]] %s923_s6  ;;  %p929_p0 = pnand %p561_p13, %p896_p3 }
  0x1e   : > { %s520_s11 = sshll.u32 %s199_s9, 3  ;;  %s212_s21 = sand.u32 1, %s819_s19  }
  0x1f   : > { %s1039_s1 = sld [smem:[#allocation18_spill]]  ;;  %s216_s22 = scalar_lea.vmem [#allocation5], %s518_s7 }
  0x20   : > { %s227_s24 = sshll.u32 %s216_s22, 4  ;;  %s213_s18 = scalar_lea.sflag [#allocation6], %s212_s21  ;;  %s228_s24 = int_to_ptr.vmem [resolvable:$true] %s227_s24 }
  0x21   : > { %p527_p1 = scmp.ge.s32.totalorder %s819_s19, 1  ;;  %p255_p2 = scmp.lt.s32.totalorder %s819_s19, 9 }
  0x22   : > { %s201_s25 = scalar_lea.hbm %s1018_s0, %s520_s11  ;;  %s191_s22 = scalar_lea.sflag [#allocation3], %s190_s5 }
  0x23   : > { %p941_p3 = pnand %p527_p1, %p255_p2  ;;  %s203_s29 = sshll.u32 %s201_s25, 4  ;;  %s204_s29 = int_to_ptr.hbm [resolvable:$true] %s203_s29 }
  0x24   : > { %s238_s6 = scalar_lea.vmem [#allocation7], %s518_s7  ;;  %s958_s8 = sand.u32 (!%p941_p3), 1, %s795_s13  }
  0x25   : > { %s223_s30 = scalar_lea.hbm %s1039_s1, %s520_s11  ;;  %s250_s14 = sshll.u32 %s238_s6, 4  ;;  %s251_s14 = int_to_ptr.vmem [resolvable:$true] %s250_s14 }
  0x26   : > { %s225_s23 = sshll.u32 %s223_s30, 4  ;;  %s194_s30 = scalar_lea.vmem [#allocation2], %s518_s7  ;;  %s226_s23 = int_to_ptr.hbm [resolvable:$true] %s225_s23 }
  0x27   : > { %553 = dma.hbm_to_vmem [thread:$0]  (!%p929_p0), %s226_s23, 128, %s228_s24, %s213_s18  }
  0x28   : > { %s205_s1 = sshll.u32 %s194_s30, 4  ;;  %s246_s24 = scalar_lea.hbm %s1020_s2, %s520_s11  ;;  %s206_s1 = int_to_ptr.vmem [resolvable:$true] %s205_s1 }
  0x29   : > { %550 = dma.hbm_to_vmem [thread:$0]  (!%p929_p0), %s204_s29, 128, %s206_s1, %s191_s22  }
  0x2a   : > { %s248_s17 = sshll.u32 %s246_s24, 4  ;;  %259 = sbr.rel (%p941_p3) target bundleno = 186 (0xba), region = 32  ;;  %s249_s17 = int_to_ptr.hbm [resolvable:$true] %s248_s17 }
  0x2b   : > { %556 = dma.hbm_to_vmem [thread:$0]  (!%p929_p0), %s249_s17, 128, %s251_s14, %s213_s18  }
  0x2c   : > { %s528_s1 = sshll.u32 (!%p941_p3), %s958_s8, 3  ;;  %s262_s5 = scalar_lea.sflag (!%p941_p3), [#allocation3], %s958_s8 }
  0x2d   : > { %s265_s9 = scalar_lea.vmem (!%p941_p3), [#allocation2], %s528_s1 }
  0x2f   : > { %778 = dma.done.wait (%p906_p8), %s262_s5, 128  }
  0x30   : > { %780 = vsyncadd (%p906_p8), %s262_s5, 4294967168  ;;  %s271_s14 = sand.u32 1, %s882_s20   ;;  %s275_s18 = scalar_lea.vmem [#allocation5], %s528_s1 }
  0x31   : > { %s272_s17 = scalar_lea.sflag [#allocation6], %s271_s14 }
  0x32   : > { %782 = dma.done.wait (%p906_p8), %s272_s17, 256  }
  0x33   : > { %784 = vsyncadd (%p906_p8), %s272_s17, 4294967040  ;;  %vm322_vm0 = vcmask 64512   ;;  %v320_v0 = vld [vmem:[%s275_s18] sm:$0xff]  ;;  %v319_v1 = vld [vmem:[%s265_s9] sm:$0xff]  ;;  %s535_s6 = sshll.u32 %s807_s16, 2  ;;  %s285_s27 = scalar_lea.vmem [#allocation7], %s528_s1 }
  0x34   : > { %532 = vmatpush.xpose.msk.msra.mxu0 %vm322_vm0, %v320_v0  ;;  %s363_s7 = sadd.s32 %s803_s15, %s535_s6  ;;  %v321_v2 = vld [vmem:[%s285_s27] sm:$0xff]  ;;  %s318_s25 = scalar_lea.vmem [#allocation8], %s528_s1 }
  0x35   : > { %s536_s20 = sshll.u32 %s363_s7, 3  ;;  %s367_s29 = sshll.u32 %s318_s25, 4  ;;  %s368_s29 = int_to_ptr.vmem [resolvable:$true] %s367_s29 }
  0x36   : > { %s365_s26 = scalar_lea.hbm %s1021_s3, %s536_s20  ;;  %s351_s22 = scalar_lea.sflag [#allocation4], %s958_s8 }
  0x37   : > { %533 = vmatmul.msk.f32.vlgmr.msra.gmra.mxu0 %vm322_vm0, %v319_v1  ;;  %s369_s30 = sshll.u32 %s365_s26, 4  ;;  %s737_s24 = scalar_lea.hbm %s1021_s3, 64  ;;  %s370_s30 = int_to_ptr.hbm [resolvable:$true] %s369_s30 }
  0x38   : > { %s731_s16 = sshra.s32 %s370_s30, 4  ;;  %s732_s16 = int_to_ptr.hbm [resolvable:$true] %s731_s16 }
  0x39   : > { %s733_s15 = scalar_lea.hbm %s732_s16, 8  ;;  %p738_p7 = scmp.lt.s32.totalorder %s732_s16, %s1021_s3 }
  0x3a   : > { %p734_p4 = scmp.ne.s32.totalorder %s732_s16, %s733_s15  ;;  %p739_p8 = scmp.lt.s32.totalorder %s737_s24, %s733_s15 }
  0x3c   : > { %p735_p5 = pnand %p734_p4, %p910_p9  ;;  %p740_p10 = por %p739_p8, %p738_p7 }
  0x3e   : > { %p736_p6 = pneg %p735_p5 }
  0x40   : > { %p741_p11 = pnand %p740_p10, %p736_p6 }
  0xb4   : > { %v346_v3 = vpop.f32.mrf.mxu0 }
  0xb5   : > { %v347_v4 = vadd.f32 %v346_v3, %v321_v2 }
  0xb7   : > { %349 = vst.msk [vmem:[%s318_s25] sm:$0xff] %vm322_vm0, %v347_v4 }
  0xb8   : > { %744 = shalt.err (!%p741_p11)
}
  0xb9   : > { %545 = dma.vmem_to_hbm [thread:$0]  (%p910_p9), %s368_s29, 128, %s370_s30, %s351_s22  }
  0xba PF: > { %p562_p13 = scmp.ge.s32.totalorder %s819_s19, 2  ;;  %s381_s8 = sand.u32 1, %s791_s12  }
  0xbb   : > { %s382_s9 = scalar_lea.sflag [#allocation4], %s381_s8 }
  0xbc   : > { %p558_p0 = pnand %p562_p13, %p916_p12 }
  0xbe   : > { %p559_p1 = pneg %p558_p0 }
  0xc0   : > { %786 = dma.done.wait (%p559_p1), %s382_s9, 128  }
  0xc1   : > { %788 = vsyncadd (%p559_p1), %s382_s9, 4294967168  ;;  %s22_s19 = sadd.s32 1, %s819_s19   ;;  %s1041_s14 = sld [smem:[#allocation12_spill]] }
  0xc2   : > { %p19_p2 = scmp.ge.s32.totalorder %s22_s19, 10   ;;  %s1042_s17 = sld [smem:[#allocation17_spill]] }
  0xc3   : > { %s1043_s15 = sld [smem:[#allocation13_spill]]  ;;  %s1047_s12 = smov %s795_s13 }
  0xc4   : > { %s1044_s16 = sld [smem:[#allocation14_spill]] }
  0xc5   : > { %s1045_s28 = sld [smem:[#allocation15_spill]] }
  0xc6   : > { %s1046_s18 = sld [smem:[#allocation16_spill]] }
  0xc7   : > { %s1048_s13 = smov %s1041_s14  ;;  %21 = sbr.rel (!%p19_p2) target bundleno = 11 (0xb), region = 101 }
  0xc8   : > { %s1049_s14 = smov %s1042_s17 }
  0xcb   : > { %s1050_s17 = smov %s1045_s28 }
  0xcc   :  { %388 = vsyncpa [#allocation3], 1 }
  0xcd   :  { %390 = vsyncpa [#allocation3 + $0x1], 1 }
  0xce   :  { %391 = vsyncpa [#allocation6], 1 }
  0xcf   :  { %393 = vsyncpa [#allocation6 + $0x1], 1 }
  0xd0   :  { %394 = vsyncpa [#allocation4], 1 }
  0xd1   :  { %396 = vsyncpa [#allocation4 + $0x1], 1 }

</bundles_post_ra>
